<compile_context>
chip_gen: v6e
topology: v6e:2x2x1
jax: 0.10.0
libtpu: 0.0.40
codegen_flags: <defaults>
</compile_context>

<pallas_src>
import functools

import jax
import jax.numpy as jnp
from jax.experimental import pallas as pl
from jax.experimental.pallas import tpu as pltpu


def _round_up(x, m):
    return (x + m - 1) // m * m


def _cdiv(a, b):
    return -(-a // b)


def _choose_tiling(n, tm_target):
    """Pick (tm, n_pad, num_steps): ≤7 padded rows, ≥2 & even steps for v7x megacore."""
    n8 = _round_up(max(n, 1), 8)
    num_steps = max(1, _cdiv(n8, tm_target))
    if n8 >= 16:                       # enough rows to split across two TensorCores
        num_steps = max(2, num_steps)
        if num_steps % 2:
            num_steps += 1             # balanced 2-core sharding on v7x
    tm = _round_up(_cdiv(n8, num_steps), 8)
    return tm, num_steps * tm, num_steps


# ---------------------------------------------------------------------------
# Fused MLP kernel (one grid step = one batch tile, all layers).
#   x_ref  : (tm, in_dim)        activation tile, UNPADDED lanes
#   w_ref  : (L, F, F)           all layer weights, zero-padded to common width F
#   b_ref  : (L-1, 1, F)         hidden-layer biases (final layer is bias-free)
#   o_ref  : (tm, out_dim)       output tile (narrow masked store, tiny writeback)
#   h0_ref : (tm, F) VMEM        scratch used to lane-pad the input tile in VMEM
# ---------------------------------------------------------------------------
def _mlp_fused_kernel(x_ref, w_ref, b_ref, o_ref, h0_ref, *, n_layers, in_dim, out_dim):
    # Lane-pad the input tile inside VMEM (zeros + masked sub-slice store); the
    # wrapper never writes a padded (n, 128) copy of x to HBM.
    h0_ref[...] = jnp.zeros_like(h0_ref)
    h0_ref[:, :in_dim] = x_ref[...].astype(jnp.float32)
    h = h0_ref[...]

    # Hidden layers (statically unrolled): Linear + bias + tanh (tanh → EUP slot).
    for li in range(n_layers - 1):
        h = jnp.dot(h, w_ref[li], preferred_element_type=jnp.float32)
        h = jnp.tanh(h + b_ref[li])

    # Final layer: bias-free Linear, no activation.  The matmul stays lane-dense
    # (F-wide, padded weight cols are zero) but only the real out_dim lanes are stored.
    h = jnp.dot(h, w_ref[n_layers - 1], preferred_element_type=jnp.float32)
    o_ref[...] = h[:, :out_dim].astype(o_ref.dtype)


# ---------------------------------------------------------------------------
# Wrapper: pads/stacks params once, tiles the batch, single pallas_call.
# ---------------------------------------------------------------------------
def mlp_forward(params, x, *, tm_target=1024):
    """Forward pass of [Linear->Tanh]*(L-1) + Linear(bias=False) as ONE fused kernel."""
    n_layers = len(params)
    in_dim = params[0][0].shape[0]
    out_dim = params[-1][0].shape[1]
    dtype = x.dtype

    # Common lane-dense padded feature width (multiple of 128, covers every layer).
    widths = [in_dim] + [w.shape[1] for (w, _) in params]
    f_pad = _round_up(max(widths + [128]), 128)

    # Zero-pad & stack weights once; biases only for the L-1 hidden layers.
    # (Zeros propagate harmlessly: padded input lanes are 0, padded W rows/cols are 0,
    #  padded biases are 0, tanh(0)=0.)
    ws, bs = [], []
    for li, (w, b) in enumerate(params):
        k, m = w.shape
        ws.append(jnp.zeros((f_pad, f_pad), dtype).at[:k, :m].set(w))
        if li < n_layers - 1:
            bs.append(jnp.zeros((1, f_pad), dtype).at[0, :m].set(b))
    W = jnp.stack(ws)                                            # (L, f_pad, f_pad)
    B = jnp.stack(bs) if bs else jnp.zeros((1, 1, f_pad), dtype)  # degenerate L==1 case
    n_b = B.shape[0]

    # Remainder-aware batch tiling (rows only; no lane padding of x in HBM).
    n = x.shape[0]
    tm, n_pad, num_steps = _choose_tiling(n, tm_target)
    xp = x if n_pad == n else jnp.zeros((n_pad, in_dim), dtype).at[:n].set(x)

    # Explicit VMEM budget (bytes): resident weight stack (x2 buffers worst case),
    # resident biases, double-buffered streamed x/out tiles, pad scratch, and a couple
    # of live activation temporaries.  Raise the scoped limit only if we exceed it.
    itemsize = jnp.dtype(dtype).itemsize
    vmem_est = (2 * n_layers * f_pad * f_pad * itemsize
                + 2 * n_b * f_pad * itemsize
                + 2 * tm * (in_dim + out_dim) * itemsize
                + tm * f_pad * 4
                + 2 * tm * f_pad * 4)
    cp_kwargs = dict(dimension_semantics=("parallel",))          # megacore on v7x
    if vmem_est > 24 * 1024 * 1024:
        cp_kwargs["vmem_limit_bytes"] = int(min(2 * vmem_est, 56 * 1024 * 1024))

    kernel = functools.partial(_mlp_fused_kernel, n_layers=n_layers,
                               in_dim=in_dim, out_dim=out_dim)
    out = pl.pallas_call(
        kernel,
        out_shape=jax.ShapeDtypeStruct((n_pad, out_dim), dtype),
        grid=(num_steps,),
        in_specs=[
            pl.BlockSpec((tm, in_dim), lambda i: (i, 0)),              # x: streamed, unpadded
            pl.BlockSpec((n_layers, f_pad, f_pad), lambda i: (0, 0, 0)),  # weights: resident
            pl.BlockSpec((n_b, 1, f_pad), lambda i: (0, 0, 0)),        # hidden biases: resident
        ],
        out_specs=pl.BlockSpec((tm, out_dim), lambda i: (i, 0)),       # narrow output
        scratch_shapes=[pltpu.VMEM((tm, f_pad), jnp.float32)],         # in-VMEM lane pad
        compiler_params=pltpu.CompilerParams(**cp_kwargs),
    )(xp, W, B)
    return out if n_pad == n else out[:n]


# ---------------------------------------------------------------------------
# Parameter init (mirrors nn.Linear default: U(-1/sqrt(fan_in), 1/sqrt(fan_in)))
# Weights stored as (in_features, out_features) so Y = X @ W (+ b).
# ---------------------------------------------------------------------------
def init_mlp_params(key, layers, dtype=jnp.float32):
    params = []
    n_layers = len(layers) - 1
    for li in range(n_layers):
        fan_in, fan_out = layers[li], layers[li + 1]
        bound = 1.0 / jnp.sqrt(jnp.array(fan_in, dtype))
        key, kw, kb = jax.random.split(key, 3)
        w = jax.random.uniform(kw, (fan_in, fan_out), dtype, -bound, bound)
        if li < n_layers - 1:
            b = jax.random.uniform(kb, (fan_out,), dtype, -bound, bound)
            params.append((w, b))
        else:
            params.append((w, None))      # final layer: bias=False
    return params


def mlp_reference(params, x):
    """Pure-JAX reference matching the PyTorch module, for correctness check."""
    h = x
    for li, (w, b) in enumerate(params):
        h = h @ w
        if li < len(params) - 1:
            h = jnp.tanh(h + b)
    return h


# ---------------------------------------------------------------------------
if __name__ == "__main__":
    # Burgers-style PINN MLP: input (x, t) -> 2, hidden 32s, scalar output.
    layers = [2, 32, 32, 32, 1]
    params = init_mlp_params(jax.random.PRNGKey(0), layers)

    # Case 1: small batch (two parallel tiles of 32 rows).
    key = jax.random.PRNGKey(0)
    key, kx = jax.random.split(key)
    X_small = jax.random.normal(kx, (64, layers[0]), jnp.float32)
    out_small = jax.block_until_ready(mlp_forward(params, X_small))
    ref_small = mlp_reference(params, X_small)
    assert out_small.shape == (64, layers[-1]), out_small.shape
    assert jnp.allclose(out_small, ref_small, atol=1e-5, rtol=1e-5), \
        float(jnp.max(jnp.abs(out_small - ref_small)))

    # Case 2: larger, non-tile-aligned batch (exercises grid pipelining + row padding).
    key, kx2 = jax.random.split(key)
    X_big = jax.random.normal(kx2, (1100, layers[0]), jnp.float32)
    out_big = jax.block_until_ready(mlp_forward(params, X_big))
    ref_big = mlp_reference(params, X_big)
    assert out_big.shape == (1100, layers[-1]), out_big.shape
    assert jnp.allclose(out_big, ref_big, atol=1e-5, rtol=1e-5), \
        float(jnp.max(jnp.abs(out_big - ref_big)))

    print("KERNEL_OK")
</pallas_src>

<mosaic_0001>
module attributes {stable_mosaic.version = 11 : i64} {
  func.func @_mlp_fused_kernel(%arg0: i32, %arg1: memref<32x2xf32, #tpu.memory_space<vmem>>, %arg2: memref<4x128x128xf32, #tpu.memory_space<vmem>>, %arg3: memref<3x1x128xf32, #tpu.memory_space<vmem>>, %arg4: memref<32x1xf32, #tpu.memory_space<vmem>>, %arg5: memref<32x128xf32, #tpu.memory_space<vmem>>) attributes {dimension_semantics = [#tpu.dimension_semantics<parallel>], iteration_bounds = array<i64: 2>, scalar_prefetch = 0 : i64, scratch_operands = 1 : i64, tpu.core_type = #tpu.core_type<tc>, window_params = [{transform_indices = @transform_0, window_bounds = array<i64: 32, 2>}, {pipeline_mode = #tpu.pipeline_mode<synchronous>, transform_indices = @transform_1, window_bounds = array<i64: 4, 128, 128>}, {pipeline_mode = #tpu.pipeline_mode<synchronous>, transform_indices = @transform_2, window_bounds = array<i64: 3, 1, 128>}, {transform_indices = @transform_3, window_bounds = array<i64: 32, 1>}]} {
    %cst = arith.constant 0.000000e+00 : f32
    %0 = vector.broadcast %cst : f32 to vector<32x128xf32>
    %c0 = arith.constant 0 : index
    %c0_0 = arith.constant 0 : index
    %1 = vector.load %arg5[%c0, %c0_0] : memref<32x128xf32, #tpu.memory_space<vmem>>, vector<32x128xf32>
    tpu.vector_store %arg5[%c0, %c0_0], %0 {strides = array<i32>} : memref<32x128xf32, #tpu.memory_space<vmem>>, vector<32x128xf32>,
    %c0_1 = arith.constant 0 : index
    %c0_2 = arith.constant 0 : index
    %2 = vector.load %arg1[%c0_1, %c0_2] : memref<32x2xf32, #tpu.memory_space<vmem>>, vector<32x2xf32>
    %c0_3 = arith.constant 0 : index
    %c0_4 = arith.constant 0 : index
    %3 = vector.load %arg5[%c0_3, %c0_4] : memref<32x128xf32, #tpu.memory_space<vmem>>, vector<32x2xf32>
    tpu.vector_store %arg5[%c0_3, %c0_4], %2 {strides = array<i32>} : memref<32x128xf32, #tpu.memory_space<vmem>>, vector<32x2xf32>,
    %c0_5 = arith.constant 0 : index
    %c0_6 = arith.constant 0 : index
    %4 = vector.load %arg5[%c0_5, %c0_6] : memref<32x128xf32, #tpu.memory_space<vmem>>, vector<32x128xf32>
    %c0_7 = arith.constant 0 : index
    %c0_8 = arith.constant 0 : index
    %c0_9 = arith.constant 0 : index
    %5 = vector.load %arg2[%c0_7, %c0_8, %c0_9] : memref<4x128x128xf32, #tpu.memory_space<vmem>>, vector<1x128x128xf32>
    %6 = vector.shape_cast %5 : vector<1x128x128xf32> to vector<128x128xf32>
    %cst_10 = arith.constant dense<0.000000e+00> : vector<32x128xf32>
    %7 = tpu.matmul %4, %6, %cst_10 {dimension_numbers = #tpu.dot_dimension_numbers<[1], [0], [0], [1], [0, 0, 1, 1], [], []>} : vector<32x128xf32>, vector<128x128xf32>, vector<32x128xf32> -> vector<32x128xf32>
    %c0_11 = arith.constant 0 : index
    %c0_12 = arith.constant 0 : index
    %c0_13 = arith.constant 0 : index
    %8 = vector.load %arg3[%c0_11, %c0_12, %c0_13] : memref<3x1x128xf32, #tpu.memory_space<vmem>>, vector<1x1x128xf32>
    %9 = vector.shape_cast %8 : vector<1x1x128xf32> to vector<1x128xf32>
    %10 = vector.broadcast %9 : vector<1x128xf32> to vector<32x128xf32>
    %11 = arith.addf %7, %10 : vector<32x128xf32>
    %12 = math.tanh %11 : vector<32x128xf32>
    %c1 = arith.constant 1 : index
    %c0_14 = arith.constant 0 : index
    %c0_15 = arith.constant 0 : index
    %13 = vector.load %arg2[%c1, %c0_14, %c0_15] : memref<4x128x128xf32, #tpu.memory_space<vmem>>, vector<1x128x128xf32>
    %14 = vector.shape_cast %13 : vector<1x128x128xf32> to vector<128x128xf32>
    %cst_16 = arith.constant dense<0.000000e+00> : vector<32x128xf32>
    %15 = tpu.matmul %12, %14, %cst_16 {dimension_numbers = #tpu.dot_dimension_numbers<[1], [0], [0], [1], [0, 0, 1, 1], [], []>} : vector<32x128xf32>, vector<128x128xf32>, vector<32x128xf32> -> vector<32x128xf32>
    %c1_17 = arith.constant 1 : index
    %c0_18 = arith.constant 0 : index
    %c0_19 = arith.constant 0 : index
    %16 = vector.load %arg3[%c1_17, %c0_18, %c0_19] : memref<3x1x128xf32, #tpu.memory_space<vmem>>, vector<1x1x128xf32>
    %17 = vector.shape_cast %16 : vector<1x1x128xf32> to vector<1x128xf32>
    %18 = vector.broadcast %17 : vector<1x128xf32> to vector<32x128xf32>
    %19 = arith.addf %15, %18 : vector<32x128xf32>
    %20 = math.tanh %19 : vector<32x128xf32>
    %c2 = arith.constant 2 : index
    %c0_20 = arith.constant 0 : index
    %c0_21 = arith.constant 0 : index
    %21 = vector.load %arg2[%c2, %c0_20, %c0_21] : memref<4x128x128xf32, #tpu.memory_space<vmem>>, vector<1x128x128xf32>
    %22 = vector.shape_cast %21 : vector<1x128x128xf32> to vector<128x128xf32>
    %cst_22 = arith.constant dense<0.000000e+00> : vector<32x128xf32>
    %23 = tpu.matmul %20, %22, %cst_22 {dimension_numbers = #tpu.dot_dimension_numbers<[1], [0], [0], [1], [0, 0, 1, 1], [], []>} : vector<32x128xf32>, vector<128x128xf32>, vector<32x128xf32> -> vector<32x128xf32>
    %c2_23 = arith.constant 2 : index
    %c0_24 = arith.constant 0 : index
    %c0_25 = arith.constant 0 : index
    %24 = vector.load %arg3[%c2_23, %c0_24, %c0_25] : memref<3x1x128xf32, #tpu.memory_space<vmem>>, vector<1x1x128xf32>
    %25 = vector.shape_cast %24 : vector<1x1x128xf32> to vector<1x128xf32>
    %26 = vector.broadcast %25 : vector<1x128xf32> to vector<32x128xf32>
    %27 = arith.addf %23, %26 : vector<32x128xf32>
    %28 = math.tanh %27 : vector<32x128xf32>
    %c3 = arith.constant 3 : index
    %c0_26 = arith.constant 0 : index
    %c0_27 = arith.constant 0 : index
    %29 = vector.load %arg2[%c3, %c0_26, %c0_27] : memref<4x128x128xf32, #tpu.memory_space<vmem>>, vector<1x128x128xf32>
    %30 = vector.shape_cast %29 : vector<1x128x128xf32> to vector<128x128xf32>
    %cst_28 = arith.constant dense<0.000000e+00> : vector<32x128xf32>
    %31 = tpu.matmul %28, %30, %cst_28 {dimension_numbers = #tpu.dot_dimension_numbers<[1], [0], [0], [1], [0, 0, 1, 1], [], []>} : vector<32x128xf32>, vector<128x128xf32>, vector<32x128xf32> -> vector<32x128xf32>
    %32 = vector.extract_strided_slice %31 {offsets = [0, 0], sizes = [32, 1], strides = [1, 1]} : vector<32x128xf32> to vector<32x1xf32>
    %c0_29 = arith.constant 0 : index
    %c0_30 = arith.constant 0 : index
    %33 = vector.load %arg4[%c0_29, %c0_30] : memref<32x1xf32, #tpu.memory_space<vmem>>, vector<32x1xf32>
    tpu.vector_store %arg4[%c0_29, %c0_30], %32 {strides = array<i32>} : memref<32x1xf32, #tpu.memory_space<vmem>>, vector<32x1xf32>,
    return
  }
  func.func @transform_0(%arg0: i32) -> (i32, i32) {
    %c0_i32 = arith.constant 0 : i32
    %c0_i32_0 = arith.constant 0 : i32
    return %arg0, %c0_i32 : i32, i32
  }
  func.func @transform_1(%arg0: i32) -> (i32, i32, i32) {
    %c0_i32 = arith.constant 0 : i32
    %c0_i32_0 = arith.constant 0 : i32
    %c0_i32_1 = arith.constant 0 : i32
    %c0_i32_2 = arith.constant 0 : i32
    return %c0_i32, %c0_i32_0, %c0_i32_1 : i32, i32, i32
  }
  func.func @transform_2(%arg0: i32) -> (i32, i32, i32) {
    %c0_i32 = arith.constant 0 : i32
    %c0_i32_0 = arith.constant 0 : i32
    %c0_i32_1 = arith.constant 0 : i32
    %c0_i32_2 = arith.constant 0 : i32
    return %c0_i32, %c0_i32_0, %c0_i32_1 : i32, i32, i32
  }
  func.func @transform_3(%arg0: i32) -> (i32, i32) {
    %c0_i32 = arith.constant 0 : i32
    %c0_i32_0 = arith.constant 0 : i32
    return %arg0, %c0_i32 : i32, i32
  }
}

</mosaic_0001>

<bundles_post_ra>
// kernel: tpu_custom_call.1
= control target key start
LH: loop header
LB: loop body
LE: loop exit
PB: predicated region body
PF: predicated region fallthrough
CT: control target
= control target key end

     0   :  { %8 = vsyncpa [#allocation4], 0  ;;  %s1079_s12 = smov 0   ;;  %s1133_s0 = inlined_call_operand.vmem [shape: f32[64,2], index: 0, kind: input, shape index: {}]   ;;  %s1134_s1 = inlined_call_operand.hbm [shape: f32[4,128,128], index: 1, kind: input, shape index: {}]   ;;  %s1135_s2 = inlined_call_operand.vmem [shape: f32[3,1,128], index: 2, kind: input, shape index: {}]   ;;  %s1136_s3 = inlined_call_operand.vmem [shape: f32[64,1], index: 3, kind: output, shape index: {}]  }
   0x1 LB: > { %s721_s13 = sadd.s32 4294967295, %s1053_s12   ;;  %p723_p0 = scmp.ge.s32.totalorder %s1053_s12, 1  ;;  %s1053_s12 = sphi %s1079_s12, %s14_s12  }
   0x2   : > { %p113_p1 = scmp.lt.s32.totalorder %s1053_s12, 3  ;;  %s1055_s14 = smov [#allocation3]  }
   0x3   : > { %s125_s15 = sshll.u32 %s1055_s14, 4  ;;  %p1091_p3 = scmp.eq.s32.totalorder %s721_s13, 0  ;;  %s126_s15 = int_to_ptr.vmem [resolvable:$true] %s125_s15 }
   0x4   : > { %p1087_p2 = pnand %p723_p0, %p113_p1  ;;  %s1028_s18 = scalar_lea.vmem %s126_s15, 8192 }
   0x5   : > { %p1029_p7 = scmp.ne.s32.totalorder %s126_s15, %s1028_s18  ;;  %p1036_p10 = scmp.lt.s32.totalorder %s126_s15, %s126_s15 }
   0x6   : > { %p975_p4 = pneg %p1087_p2  ;;  %p1037_p11 = scmp.lt.s32.totalorder %s1028_s18, %s1028_s18 }
   0x8   : > { %p976_p5 = pnand %p1091_p3, %p975_p4  ;;  %p1038_p12 = por %p1037_p11, %p1036_p10 }
   0xa   : > { %p1019_p6 = pneg %p976_p5 }
   0xc   : > { %p1031_p8 = pnand %p1029_p7, %p1019_p6 }
   0xe   : > { %p1032_p9 = pneg %p1031_p8 }
  0x10   : > { %p1039_p13 = pnand %p1038_p12, %p1032_p9 }
  0x12   : > { %1042 = shalt.err (!%p1039_p13)
}
  0x13   : > { %s1056_s19 = smov 128   ;;  %s1057_s20 = smov 8  }
  0x14   : > { %978 = dma.hbm_to_vmem [thread:$0]  (!%p976_p5), %s1134_s1, 8192, %s126_s15, [#allocation4], %s1056_s19, %s1056_s19, %s1057_s20  }
  0x15   : > { %153 = sbr.rel (%p1087_p2) target bundleno = 896 (0x380), region = 32 }
  0x1a   : > { %1048 = dma.done.wait (%p1091_p3), [#allocation4], 8192  }
  0x1b   : > { %1050 = vsyncadd (%p1091_p3), [#allocation4], 4294959104  ;;  %s728_s23 = sshll.u32 %s721_s13, 2  ;;  %v1058_v0 = vmov 0.0   ;;  %v221_v1 = vld [vmem:[#allocation3 + $0x78] sm:$0xff]  ;;  %v220_v2 = vld [vmem:[#allocation3 + $0x70] sm:$0xff] }
  0x1c   : > { %p178_p0 = scmp.lt.s32.totalorder %s728_s23, 7  ;;  %189 = vst [vmem:[#allocation2] sm:$0xff] %v1058_v0  ;;  %190 = vst [vmem:[#allocation2 + $0x8] sm:$0xff] %v1058_v0  ;;  %819 = vmatprep.subr.mxu0 %v221_v1  ;;  %v219_v3 = vld [vmem:[#allocation3 + $0x68] sm:$0xff]  ;;  %vm197_vm0 = vcmask 15360   ;;  %v218_v4 = vld [vmem:[#allocation3 + $0x60] sm:$0xff] }
  0x1d   : > { %191 = vst [vmem:[#allocation2 + $0x10] sm:$0xff] %v1058_v0  ;;  %192 = vst [vmem:[#allocation2 + $0x18] sm:$0xff] %v1058_v0  ;;  %820 = vmatpush3.msra.mxu0 %v221_v1  ;;  %v217_v5 = vld [vmem:[#allocation3 + $0x58] sm:$0xff]  ;;  %v333_v11 = vld [vmem:[#allocation3 + $0xf0] sm:$0xff]  ;;  %vm648_vm1 = vcmask 7168  }
  0x1e   : > { %s1140_s23 = smov (!%p178_p0, %s728_s23), 7  ;;  %821 = vmatprep.subr.mxu0 %v220_v2  ;;  %v334_v10 = vld [vmem:[#allocation3 + $0xf8] sm:$0xff]  ;;  %v216_v12 = vld [vmem:[#allocation3 + $0x50] sm:$0xff]  ;;  %v332_v13 = vld [vmem:[#allocation3 + $0xe8] sm:$0xff] }
  0x1f   : > { %s729_s24 = sshll.u32 %s1140_s23, 3  ;;  %822 = vmatpush3.msra.mxu0 %v220_v2  ;;  %857 = vmatprep.subr.mxu1 %v334_v10  ;;  %v215_v14 = vld [vmem:[#allocation3 + $0x48] sm:$0xff]  ;;  %v331_v15 = vld [vmem:[#allocation3 + $0xe0] sm:$0xff]  ;;  %v330_v18 = vld [vmem:[#allocation3 + $0xd8] sm:$0xff] }
  0x20   : > { %s181_s27 = scalar_lea.vmem %s1133_s0, %s729_s24  ;;  %823 = vmatprep.subr.mxu0 %v219_v3  ;;  %858 = vmatpush3.msra.mxu1 %v334_v10  ;;  %v214_v16 = vld [vmem:[#allocation3 + $0x40] sm:$0xff]  ;;  %v213_v19 = vld [vmem:[#allocation3 + $0x38] sm:$0xff]  ;;  %v329_v20 = vld [vmem:[#allocation3 + $0xd0] sm:$0xff]  ;;  %s187_s9 = scalar_lea.vmem %s1136_s3, %s729_s24 }
  0x21   : > { %v193_v6 = vld [vmem:[%s181_s27] sm:$0xff]  ;;  %v194_v7 = vld [vmem:[%s181_s27 + $0x8] sm:$0xff]  ;;  %824 = vmatpush3.msra.mxu0 %v219_v3  ;;  %v195_v8 = vld [vmem:[%s181_s27 + $0x10] sm:$0xff]  ;;  %859 = vmatprep.subr.mxu1 %v333_v11 }
  0x22   : > { %198 = vst.msk [vmem:[#allocation2] sm:$0xff] %vm197_vm0, %v193_v6  ;;  %199 = vst.msk [vmem:[#allocation2 + $0x8] sm:$0xff] %vm197_vm0, %v194_v7  ;;  %v196_v9 = vld [vmem:[%s181_s27 + $0x18] sm:$0xff]  ;;  %825 = vmatprep.subr.mxu0 %v218_v4  ;;  %860 = vmatpush3.msra.mxu1 %v333_v11  ;;  %v212_v21 = vld [vmem:[#allocation3 + $0x30] sm:$0xff] }
  0x23   : > { %200 = vst.msk [vmem:[#allocation2 + $0x10] sm:$0xff] %vm197_vm0, %v195_v8  ;;  %201 = vst.msk [vmem:[#allocation2 + $0x18] sm:$0xff] %vm197_vm0, %v196_v9  ;;  %826 = vmatpush3.msra.mxu0 %v218_v4  ;;  %861 = vmatprep.subr.mxu1 %v332_v13  ;;  %v211_v22 = vld [vmem:[#allocation3 + $0x28] sm:$0xff]  ;;  %v210_v23 = vld [vmem:[#allocation3 + $0x20] sm:$0xff] }
  0x24   : > { %827 = vmatprep.subr.mxu0 %v217_v5  ;;  %862 = vmatpush3.msra.mxu1 %v332_v13  ;;  %v209_v24 = vld [vmem:[#allocation3 + $0x18] sm:$0xff]  ;;  %v208_v25 = vld [vmem:[#allocation3 + $0x10] sm:$0xff]  ;;  %v207_v26 = vld [vmem:[#allocation3 + $0x8] sm:$0xff] }
  0x25   : > { %828 = vmatpush3.msra.mxu0 %v217_v5  ;;  %863 = vmatprep.subr.mxu1 %v331_v15  ;;  %v206_v27 = vld [vmem:[#allocation3] sm:$0xff]  ;;  %v328_v31 = vld [vmem:[#allocation3 + $0xc8] sm:$0xff]  ;;  %v326_v33 = vld [vmem:[#allocation3 + $0xb8] sm:$0xff] }
  0x26   : > { %829 = vmatprep.subr.mxu0 %v216_v12  ;;  %864 = vmatpush3.msra.mxu1 %v331_v15  ;;  %v327_v32 = vld [vmem:[#allocation3 + $0xc0] sm:$0xff]  ;;  %v325_v34 = vld [vmem:[#allocation3 + $0xb0] sm:$0xff]  ;;  %v324_v35 = vld [vmem:[#allocation3 + $0xa8] sm:$0xff] }
  0x27   : > { %830 = vmatpush3.msra.mxu0 %v216_v12  ;;  %865 = vmatprep.subr.mxu1 %v330_v18  ;;  %v323_v36 = vld [vmem:[#allocation3 + $0xa0] sm:$0xff]  ;;  %v322_v37 = vld [vmem:[#allocation3 + $0x98] sm:$0xff]  ;;  %v321_v38 = vld [vmem:[#allocation3 + $0x90] sm:$0xff] }
  0x28   : > { %831 = vmatprep.subr.mxu0 %v215_v14  ;;  %866 = vmatpush3.msra.mxu1 %v330_v18  ;;  %v320_v39 = vld [vmem:[#allocation3 + $0x88] sm:$0xff]  ;;  %v319_v40 = vld [vmem:[#allocation3 + $0x80] sm:$0xff]  ;;  %v448_v41 = vld [vmem:[#allocation3 + $0x178] sm:$0xff] }
  0x29   : > { %v202_v17 = vld [vmem:[#allocation2] sm:$0xff]  ;;  %832 = vmatpush3.msra.mxu0 %v215_v14  ;;  %867 = vmatprep.subr.mxu1 %v329_v20  ;;  %v203_v28 = vld [vmem:[#allocation2 + $0x8] sm:$0xff]  ;;  %v447_v42 = vld [vmem:[#allocation3 + $0x170] sm:$0xff] }
  0x2a   : > { %851 = vmatprep.mubr.f32.mxu0 %v202_v17  ;;  %833 = vmatprep.subr.mxu0 %v214_v16  ;;  %v204_v29 = vld [vmem:[#allocation2 + $0x10] sm:$0xff]  ;;  %v205_v30 = vld [vmem:[#allocation2 + $0x18] sm:$0xff]  ;;  %v446_v43 = vld [vmem:[#allocation3 + $0x168] sm:$0xff] }
  0x2b   : > { %834 = vmatpush3.msra.mxu0 %v214_v16  ;;  %868 = vmatpush3.msra.mxu1 %v329_v20  ;;  %v445_v44 = vld [vmem:[#allocation3 + $0x160] sm:$0xff]  ;;  %v444_v45 = vld [vmem:[#allocation3 + $0x158] sm:$0xff]  ;;  %v443_v46 = vld [vmem:[#allocation3 + $0x150] sm:$0xff] }
  0x2c   : > { %835 = vmatprep.subr.mxu0 %v213_v19  ;;  %869 = vmatprep.subr.mxu1 %v328_v31  ;;  %v732_v47 = vld [vmem:[%s1135_s2] ss:$0 sm:$0xff]  ;;  %v442_v60 = vld [vmem:[#allocation3 + $0x148] sm:$0xff]  ;;  %v440_v62 = vld [vmem:[#allocation3 + $0x138] sm:$0xff] }
  0x2d   : > { %836 = vmatpush3.msra.mxu0 %v213_v19  ;;  %870 = vmatpush3.msra.mxu1 %v328_v31  ;;  %v441_v61 = vld [vmem:[#allocation3 + $0x140] sm:$0xff]  ;;  %v439_v63 = vld [vmem:[#allocation3 + $0x130] sm:$0xff]  ;;  %v438_v0 = vld [vmem:[#allocation3 + $0x128] sm:$0xff] }
  0x2e   : > { %837 = vmatprep.subr.mxu0 %v212_v21  ;;  %871 = vmatprep.subr.mxu1 %v327_v32  ;;  %v437_v1 = vld [vmem:[#allocation3 + $0x120] sm:$0xff]  ;;  %v436_v2 = vld [vmem:[#allocation3 + $0x118] sm:$0xff]  ;;  %v435_v3 = vld [vmem:[#allocation3 + $0x110] sm:$0xff] }
  0x2f   : > { %838 = vmatpush3.msra.mxu0 %v212_v21  ;;  %872 = vmatpush3.msra.mxu1 %v327_v32  ;;  %v434_v4 = vld [vmem:[#allocation3 + $0x108] sm:$0xff]  ;;  %v433_v5 = vld [vmem:[#allocation3 + $0x100] sm:$0xff]  ;;  %v562_v6 = vld [vmem:[#allocation3 + $0x1f8] sm:$0xff] }
  0x30   : > { %839 = vmatprep.subr.mxu0 %v211_v22  ;;  %873 = vmatprep.subr.mxu1 %v326_v33  ;;  %v561_v7 = vld [vmem:[#allocation3 + $0x1f0] sm:$0xff]  ;;  %v560_v8 = vld [vmem:[#allocation3 + $0x1e8] sm:$0xff]  ;;  %v559_v9 = vld [vmem:[#allocation3 + $0x1e0] sm:$0xff] }
  0x31   : > { %840 = vmatpush3.msra.mxu0 %v211_v22  ;;  %874 = vmatpush3.msra.mxu1 %v326_v33  ;;  %v558_v10 = vld [vmem:[#allocation3 + $0x1d8] sm:$0xff]  ;;  %v557_v11 = vld [vmem:[#allocation3 + $0x1d0] sm:$0xff]  ;;  %v734_v12 = vld [vmem:[%s1135_s2 + $0x1] ss:$0 sm:$0xff] }
  0x32   : > { %841 = vmatprep.subr.mxu0 %v210_v23  ;;  %875 = vmatprep.subr.mxu1 %v325_v34  ;;  %v550_v31 = vld [vmem:[#allocation3 + $0x198] sm:$0xff]  ;;  %v549_v32 = vld [vmem:[#allocation3 + $0x190] sm:$0xff]  ;;  %v548_v33 = vld [vmem:[#allocation3 + $0x188] sm:$0xff] }
  0x33   : > { %842 = vmatpush3.msra.mxu0 %v210_v23  ;;  %876 = vmatpush3.msra.mxu1 %v325_v34  ;;  %v547_v34 = vld [vmem:[#allocation3 + $0x180] sm:$0xff] }
  0x34   : > { %843 = vmatprep.subr.mxu0 %v209_v24  ;;  %877 = vmatprep.subr.mxu1 %v324_v35 }
  0x35   : > { %844 = vmatpush3.msra.mxu0 %v209_v24  ;;  %878 = vmatpush3.msra.mxu1 %v324_v35  ;;  %v736_v35 = vld [vmem:[%s1135_s2 + $0x2] ss:$0 sm:$0xff] }
  0x36   : > { %845 = vmatprep.subr.mxu0 %v208_v25  ;;  %879 = vmatprep.subr.mxu1 %v323_v36 }
  0x37   : > { %846 = vmatpush3.msra.mxu0 %v208_v25  ;;  %880 = vmatpush3.msra.mxu1 %v323_v36  ;;  %v556_v25 = vld [vmem:[#allocation3 + $0x1c8] sm:$0xff] }
  0x38   : > { %847 = vmatprep.subr.mxu0 %v207_v26  ;;  %881 = vmatprep.subr.mxu1 %v322_v37 }
  0x39   : > { %848 = vmatpush3.msra.mxu0 %v207_v26  ;;  %882 = vmatpush3.msra.mxu1 %v322_v37  ;;  %v555_v26 = vld [vmem:[#allocation3 + $0x1c0] sm:$0xff] }
  0x3a   : > { %849 = vmatprep.subr.mxu0 %v206_v27  ;;  %883 = vmatprep.subr.mxu1 %v321_v38 }
  0x3b   : > { %850 = vmatpush3.msra.mxu0 %v206_v27  ;;  %884 = vmatpush3.msra.mxu1 %v321_v38  ;;  %v554_v27 = vld [vmem:[#allocation3 + $0x1b8] sm:$0xff] }
  0x3c   : > { %852 = vmatmul.mubr.f32.vlgmr.msra.gmra.mxu0 %v203_v28  ;;  %885 = vmatprep.subr.mxu1 %v320_v39  ;;  %v553_v28 = vld [vmem:[#allocation3 + $0x1b0] sm:$0xff] }
  0x3d   : > { %854 = vmatprep.mubr.f32.mxu0 %v204_v29  ;;  %886 = vmatpush3.msra.mxu1 %v320_v39  ;;  %v552_v29 = vld [vmem:[#allocation3 + $0x1a8] sm:$0xff] }
  0x3e   : > { %887 = vmatprep.subr.mxu1 %v319_v40  ;;  %895 = vmatprep.subr.mxu0 %v448_v41 }
  0x3f   : > { %888 = vmatpush3.msra.mxu1 %v319_v40  ;;  %896 = vmatpush3.msra.mxu0 %v448_v41 }
  0x40   : > { %855 = vmatmul.mubr.f32.gmra.mxu0 %v205_v30  ;;  %897 = vmatprep.subr.mxu0 %v447_v42  ;;  %v551_v30 = vld [vmem:[#allocation3 + $0x1a0] sm:$0xff] }
  0x41   : > { %898 = vmatpush3.msra.mxu0 %v447_v42  ;;  %933 = vmatprep.subr.mxu1 %v562_v6 }
  0x42   : > { %899 = vmatprep.subr.mxu0 %v446_v43 }
  0x43   : > { %900 = vmatpush3.msra.mxu0 %v446_v43 }
  0x44   : > { %901 = vmatprep.subr.mxu0 %v445_v44 }
  0x45   : > { %902 = vmatpush3.msra.mxu0 %v445_v44 }
  0x46   : > { %903 = vmatprep.subr.mxu0 %v444_v45 }
  0x47   : > { %904 = vmatpush3.msra.mxu0 %v444_v45 }
  0x48   : > { %905 = vmatprep.subr.mxu0 %v443_v46 }
  0x49   : > { %906 = vmatpush3.msra.mxu0 %v443_v46 }
  0x4a   : > { %907 = vmatprep.subr.mxu0 %v442_v60 }
  0x4b   : > { %908 = vmatpush3.msra.mxu0 %v442_v60 }
  0x4c   : > { %909 = vmatprep.subr.mxu0 %v441_v61 }
  0x4d   : > { %910 = vmatpush3.msra.mxu0 %v441_v61 }
  0x4e   : > { %911 = vmatprep.subr.mxu0 %v440_v62 }
  0x4f   : > { %912 = vmatpush3.msra.mxu0 %v440_v62 }
  0x50   : > { %913 = vmatprep.subr.mxu0 %v439_v63 }
  0x51   : > { %914 = vmatpush3.msra.mxu0 %v439_v63 }
  0x52   : > { %915 = vmatprep.subr.mxu0 %v438_v0 }
  0x53   : > { %916 = vmatpush3.msra.mxu0 %v438_v0 }
  0x54   : > { %917 = vmatprep.subr.mxu0 %v437_v1 }
  0x55   : > { %918 = vmatpush3.msra.mxu0 %v437_v1 }
  0x56   : > { %919 = vmatprep.subr.mxu0 %v436_v2 }
  0x57   : > { %920 = vmatpush3.msra.mxu0 %v436_v2 }
  0x58   : > { %921 = vmatprep.subr.mxu0 %v435_v3 }
  0x59   : > { %922 = vmatpush3.msra.mxu0 %v435_v3 }
  0x5a   : > { %923 = vmatprep.subr.mxu0 %v434_v4 }
  0x5b   : > { %924 = vmatpush3.msra.mxu0 %v434_v4 }
  0x5c   : > { %925 = vmatprep.subr.mxu0 %v433_v5 }
  0x5d   : > { %926 = vmatpush3.msra.mxu0 %v433_v5 }
  0xfc   : > { %v853_v48 = vpop.f32.mrf.mxu0 }
  0xfd   : > { %v301_v49 = vadd.f32 %v853_v48, %v732_v47 }
  0xfe   : > { %v295_v50 = vpop.f32.mrf.mxu0 }
  0xff   : > { %v296_v51 = vadd.f32 %v732_v47, %v295_v50 }
 0x100   : > { %v856_v52 = vpop.f32.mrf.mxu0 }
 0x101   : > { %993 = vtanh.f32 %v296_v51  ;;  %v311_v53 = vadd.f32 %v856_v52, %v732_v47 }
 0x102   : > { %995 = vtanh.f32 %v301_v49  ;;  %v305_v54 = vpop.f32.mrf.mxu0 }
 0x103   : > { %v306_v55 = vadd.f32 %v732_v47, %v305_v54 }
 0x105   : > { %997 = vtanh.f32 %v306_v55 }
 0x106   : > { %999 = vtanh.f32 %v311_v53 }
 0x10e   : > { %v994_v56 = vpop.eup %993 }
 0x10f   : > { %v996_v57 = vpop.eup %995  ;;  %889 = vmatprep.mubr.f32.mxu1 %v994_v56 }
 0x110   : > { %890 = vmatmul.mubr.f32.vlgmr.msra.gmra.mxu1 %v996_v57 }
 0x111   : > { %934 = vmatpush3.msra.mxu1 %v562_v6 }
 0x112   : > { %v998_v58 = vpop.eup %997  ;;  %935 = vmatprep.subr.mxu1 %v561_v7 }
 0x113   : > { %v1000_v59 = vpop.eup %999  ;;  %892 = vmatprep.mubr.f32.mxu1 %v998_v58  ;;  %936 = vmatpush3.msra.mxu1 %v561_v7 }
 0x114   : > { %893 = vmatmul.mubr.f32.gmra.mxu1 %v1000_v59  ;;  %937 = vmatprep.subr.mxu1 %v560_v8 }
 0x115   : > { %938 = vmatpush3.msra.mxu1 %v560_v8 }
 0x116   : > { %939 = vmatprep.subr.mxu1 %v559_v9 }
 0x117   : > { %940 = vmatpush3.msra.mxu1 %v559_v9 }
 0x118   : > { %941 = vmatprep.subr.mxu1 %v558_v10 }
 0x119   : > { %942 = vmatpush3.msra.mxu1 %v558_v10 }
 0x11a   : > { %943 = vmatprep.subr.mxu1 %v557_v11 }
 0x11b   : > { %944 = vmatpush3.msra.mxu1 %v557_v11 }
 0x11c   : > { %945 = vmatprep.subr.mxu1 %v556_v25 }
 0x11d   : > { %946 = vmatpush3.msra.mxu1 %v556_v25 }
 0x11e   : > { %947 = vmatprep.subr.mxu1 %v555_v26 }
 0x11f   : > { %948 = vmatpush3.msra.mxu1 %v555_v26 }
 0x120   : > { %949 = vmatprep.subr.mxu1 %v554_v27 }
 0x121   : > { %950 = vmatpush3.msra.mxu1 %v554_v27 }
 0x122   : > { %951 = vmatprep.subr.mxu1 %v553_v28 }
 0x123   : > { %952 = vmatpush3.msra.mxu1 %v553_v28 }
 0x124   : > { %953 = vmatprep.subr.mxu1 %v552_v29 }
 0x125   : > { %954 = vmatpush3.msra.mxu1 %v552_v29 }
 0x126   : > { %955 = vmatprep.subr.mxu1 %v551_v30 }
 0x127   : > { %956 = vmatpush3.msra.mxu1 %v551_v30 }
 0x128   : > { %957 = vmatprep.subr.mxu1 %v550_v31 }
 0x129   : > { %958 = vmatpush3.msra.mxu1 %v550_v31 }
 0x12a   : > { %959 = vmatprep.subr.mxu1 %v549_v32 }
 0x12b   : > { %960 = vmatpush3.msra.mxu1 %v549_v32 }
 0x12c   : > { %961 = vmatprep.subr.mxu1 %v548_v33 }
 0x12d   : > { %962 = vmatpush3.msra.mxu1 %v548_v33 }
 0x12e   : > { %963 = vmatprep.subr.mxu1 %v547_v34 }
 0x12f   : > { %964 = vmatpush3.msra.mxu1 %v547_v34 }
 0x1d0   : > { %v891_v13 = vpop.f32.mrf.mxu1 }
 0x1d1   : > { %v415_v14 = vadd.f32 %v891_v13, %v734_v12 }
 0x1d2   : > { %v409_v15 = vpop.f32.mrf.mxu1 }
 0x1d3   : > { %v410_v16 = vadd.f32 %v734_v12, %v409_v15 }
 0x1d4   : > { %v894_v17 = vpop.f32.mrf.mxu1 }
 0x1d5   : > { %1001 = vtanh.f32 %v410_v16  ;;  %v425_v18 = vadd.f32 %v894_v17, %v734_v12 }
 0x1d6   : > { %1003 = vtanh.f32 %v415_v14  ;;  %v419_v19 = vpop.f32.mrf.mxu1 }
 0x1d7   : > { %v420_v20 = vadd.f32 %v734_v12, %v419_v19 }
 0x1d9   : > { %1005 = vtanh.f32 %v420_v20 }
 0x1da   : > { %1007 = vtanh.f32 %v425_v18 }
 0x1e2   : > { %v1002_v21 = vpop.eup %1001 }
 0x1e3   : > { %v1004_v22 = vpop.eup %1003  ;;  %927 = vmatprep.mubr.f32.mxu0 %v1002_v21 }
 0x1e4   : > { %928 = vmatmul.mubr.f32.vlgmr.msra.gmra.mxu0 %v1004_v22 }
 0x1e6   : > { %v1006_v23 = vpop.eup %1005 }
 0x1e7   : > { %v1008_v24 = vpop.eup %1007  ;;  %930 = vmatprep.mubr.f32.mxu0 %v1006_v23 }
 0x1e8   : > { %931 = vmatmul.mubr.f32.gmra.mxu0 %v1008_v24 }
 0x2a4   : > { %v929_v36 = vpop.f32.mrf.mxu0 }
 0x2a5   : > { %v529_v37 = vadd.f32 %v929_v36, %v736_v35 }
 0x2a6   : > { %v523_v38 = vpop.f32.mrf.mxu0 }
 0x2a7   : > { %v524_v39 = vadd.f32 %v736_v35, %v523_v38 }
 0x2a8   : > { %v932_v40 = vpop.f32.mrf.mxu0 }
 0x2a9   : > { %1009 = vtanh.f32 %v524_v39  ;;  %v539_v41 = vadd.f32 %v932_v40, %v736_v35 }
 0x2aa   : > { %1011 = vtanh.f32 %v529_v37  ;;  %v533_v42 = vpop.f32.mrf.mxu0 }
 0x2ab   : > { %v534_v43 = vadd.f32 %v736_v35, %v533_v42 }
 0x2ad   : > { %1013 = vtanh.f32 %v534_v43 }
 0x2ae   : > { %1015 = vtanh.f32 %v539_v41 }
 0x2b6   : > { %v1010_v44 = vpop.eup %1009 }
 0x2b7   : > { %v1012_v45 = vpop.eup %1011  ;;  %965 = vmatprep.mubr.f32.mxu1 %v1010_v44 }
 0x2b8   : > { %966 = vmatmul.mubr.f32.vlgmr.msra.gmra.mxu1 %v1012_v45 }
 0x2ba   : > { %v1014_v46 = vpop.eup %1013 }
 0x2bb   : > { %v1016_v47 = vpop.eup %1015  ;;  %968 = vmatprep.mubr.f32.mxu1 %v1014_v46 }
 0x2bc   : > { %969 = vmatmul.mubr.f32.gmra.mxu1 %v1016_v47 }
 0x378   : > { %v967_v48 = vpop.f32.mrf.mxu1 }
 0x379   : > { %650 = vst.msk [vmem:[%s187_s9 + $0x8] sm:$0xff] %vm648_vm1, %v967_v48 }
 0x37a   : > { %v629_v49 = vpop.f32.mrf.mxu1 }
 0x37b   : > { %649 = vst.msk [vmem:[%s187_s9] sm:$0xff] %vm648_vm1, %v629_v49 }
 0x37c   : > { %v970_v50 = vpop.f32.mrf.mxu1 }
 0x37d   : > { %652 = vst.msk [vmem:[%s187_s9 + $0x18] sm:$0xff] %vm648_vm1, %v970_v50 }
 0x37e   : > { %v639_v51 = vpop.f32.mrf.mxu1 }
 0x37f   : > { %651 = vst.msk [vmem:[%s187_s9 + $0x10] sm:$0xff] %vm648_vm1, %v639_v51 }
 0x380 PF: > { %s14_s12 = sadd.s32 1, %s1053_s12  }
 0x381   : > { %p11_p1 = scmp.ge.s32.totalorder %s14_s12, 4  }
 0x383   :  { %13 = sbr.rel (!%p11_p1) target bundleno = 1 (0x1), region = 72 }
 0x388   :  { %675 = vsyncpa [#allocation4], 1 }
 0x389   :  { %677 = vsyncpa [#allocation4 + $0x1], 1 }

</bundles_post_ra>
